<compile_context>
chip_gen: v6e
topology: v6e:2x2x1
jax: 0.10.0
libtpu: 0.0.40
codegen_flags: <defaults>
</compile_context>

<pallas_src>
import functools
import math

import jax
import jax.numpy as jnp
from jax.experimental import pallas as pl
from jax.experimental.pallas import tpu as pltpu


def _layer_norm_kernel(x_ref, alpha_ref, bias_ref, o_ref, *, eps, d):
    # x_ref/o_ref: (row_tile, D) block of flattened rows.
    # alpha_ref/bias_ref: (1, 1) scalar parameters.
    x = x_ref[...].astype(jnp.float32)                       # compute stats in f32
    mean = jnp.mean(x, axis=-1, keepdims=True)                # (TR, 1)
    centered = x - mean
    # torch.Tensor.std default is unbiased (divide by N-1).
    denom = float(max(d - 1, 1))
    var = jnp.sum(centered * centered, axis=-1, keepdims=True) * (1.0 / denom)
    std = jnp.sqrt(var)
    alpha = alpha_ref[0, 0]
    bias = bias_ref[0, 0]
    y = alpha * centered / (std + eps) + bias
    o_ref[...] = y.astype(o_ref.dtype)


def _pick_row_tile(n_rows: int, d: int, itemsize: int) -> int:
    """Largest multiple-of-8 row tile that keeps the working set ~24 MiB.

    Working set = x block + out block, each double-buffered by the pipeline
    (4 * row_tile * D * itemsize).  24 MiB leaves headroom under v7x's
    32 MiB default scoped / 64 MiB physical VMEM (v5e/v6e have more).
    """
    budget = 24 * 1024 * 1024
    max_rows = max(8, budget // (4 * d * itemsize))
    tr = min(1024, max_rows)
    tr = max(8, (tr // 8) * 8)
    if n_rows <= tr:
        # Single block: a block dim equal to the full array dim is always legal.
        return n_rows
    return tr


def layer_norm_forward(x, alpha, bias, *, eps=1e-6, row_tile=None):
    """LayerNormalization over the last dim of x (any leading shape)."""
    orig_shape = x.shape
    d = orig_shape[-1]
    n_rows = int(math.prod(orig_shape[:-1])) if len(orig_shape) > 1 else 1
    x2 = x.reshape(n_rows, d)

    if row_tile is None:
        row_tile = _pick_row_tile(n_rows, d, jnp.dtype(x.dtype).itemsize)
    grid = (pl.cdiv(n_rows, row_tile),)

    alpha2 = jnp.asarray(alpha, jnp.float32).reshape(1, 1)
    bias2 = jnp.asarray(bias, jnp.float32).reshape(1, 1)

    kernel = functools.partial(_layer_norm_kernel, eps=float(eps), d=int(d))

    out = pl.pallas_call(
        kernel,
        out_shape=jax.ShapeDtypeStruct((n_rows, d), x.dtype),
        grid_spec=pltpu.PrefetchScalarGridSpec(
            num_scalar_prefetch=0,
            grid=grid,
            in_specs=[
                pl.BlockSpec((row_tile, d), lambda i: (i, 0)),   # x rows
                pl.BlockSpec((1, 1), lambda i: (0, 0)),          # alpha (reused)
                pl.BlockSpec((1, 1), lambda i: (0, 0)),          # bias  (reused)
            ],
            out_specs=pl.BlockSpec((row_tile, d), lambda i: (i, 0)),
        ),
        compiler_params=pltpu.CompilerParams(
            # Row tiles are independent -> shard across both v7x TensorCores.
            dimension_semantics=("parallel",),
        ),
    )(x2, alpha2, bias2)
    return out.reshape(orig_shape)


def encoder_forward(x, alpha, bias, *, mask=None, layer_fns=(), eps=1e-6,
                    row_tile=None):
    """Encoder.forward: apply the layer stack, then the Pallas LayerNorm."""
    # TODO(synk): the spec's nn.ModuleList layers are opaque (no definitions);
    # any provided JAX callables (x, mask) -> x are applied here as glue.
    for layer in layer_fns:
        x = layer(x, mask)
    return layer_norm_forward(x, alpha, bias, eps=eps, row_tile=row_tile)


if __name__ == "__main__":
    # Small shapes consistent with the module: batch=2, seq=16, d_model=128.
    batch, seq, d_model = 2, 16, 128
    eps = 1e-6

    key = jax.random.PRNGKey(0)
    x = jax.random.normal(key, (batch, seq, d_model), dtype=jnp.float32)
    alpha = jnp.ones((1,), jnp.float32)   # nn.Parameter(torch.ones(1))
    bias = jnp.zeros((1,), jnp.float32)   # nn.Parameter(torch.zeros(1))
    mask = None                           # unused: layer bodies are unspecified

    # row_tile=8 -> 8-row blocks, 8 grid steps, exercises the tiled pipeline.
    y = encoder_forward(x, alpha, bias, mask=mask, eps=eps, row_tile=8)
    y = jax.block_until_ready(y)

    # Plain-JAX reference matching torch semantics (unbiased std).
    mean = x.mean(axis=-1, keepdims=True)
    var = ((x - mean) ** 2).sum(axis=-1, keepdims=True) / (d_model - 1)
    ref = alpha * (x - mean) / (jnp.sqrt(var) + eps) + bias

    assert y.shape == x.shape
    assert jnp.allclose(y, ref, atol=1e-5, rtol=1e-5), "layernorm mismatch"

    print("KERNEL_OK")
</pallas_src>

<mosaic_0001>
module attributes {stable_mosaic.version = 11 : i64} {
  func.func @_layer_norm_kernel(%arg0: i32, %arg1: memref<8x128xf32, #tpu.memory_space<vmem>>, %arg2: memref<1x1xf32, #tpu.memory_space<vmem>>, %arg3: memref<1x1xf32, #tpu.memory_space<vmem>>, %arg4: memref<8x128xf32, #tpu.memory_space<vmem>>) attributes {dimension_semantics = [#tpu.dimension_semantics<parallel>], iteration_bounds = array<i64: 4>, scalar_prefetch = 0 : i64, scratch_operands = 0 : i64, tpu.core_type = #tpu.core_type<tc>, window_params = [{transform_indices = @transform_0, window_bounds = array<i64: 8, 128>}, {pipeline_mode = #tpu.pipeline_mode<synchronous>, transform_indices = @transform_1, window_bounds = array<i64: 1, 1>}, {pipeline_mode = #tpu.pipeline_mode<synchronous>, transform_indices = @transform_2, window_bounds = array<i64: 1, 1>}, {transform_indices = @transform_3, window_bounds = array<i64: 8, 128>}]} {
    %c0 = arith.constant 0 : index
    %c0_0 = arith.constant 0 : index
    %0 = vector.load %arg1[%c0, %c0_0] : memref<8x128xf32, #tpu.memory_space<vmem>>, vector<8x128xf32>
    %cst = arith.constant dense<0.000000e+00> : vector<8xf32>
    %1 = vector.multi_reduction <add>, %0, %cst [1] : vector<8x128xf32> to vector<8xf32>
    %2 = vector.shape_cast %1 : vector<8xf32> to vector<8x1xf32>
    %cst_1 = arith.constant 1.280000e+02 : f32
    %3 = vector.broadcast %cst_1 : f32 to vector<8x1xf32>
    %4 = arith.divf %2, %3 : vector<8x1xf32>
    %5 = vector.broadcast %4 : vector<8x1xf32> to vector<8x128xf32>
    %6 = arith.subf %0, %5 : vector<8x128xf32>
    %7 = arith.mulf %6, %6 : vector<8x128xf32>
    %cst_2 = arith.constant dense<0.000000e+00> : vector<8xf32>
    %8 = vector.multi_reduction <add>, %7, %cst_2 [1] : vector<8x128xf32> to vector<8xf32>
    %9 = vector.shape_cast %8 : vector<8xf32> to vector<8x1xf32>
    %cst_3 = arith.constant 0.00787401571 : f32
    %10 = vector.broadcast %cst_3 : f32 to vector<8x1xf32>
    %11 = arith.mulf %9, %10 : vector<8x1xf32>
    %12 = math.sqrt %11 : vector<8x1xf32>
    %c0_4 = arith.constant 0 : index
    %c0_5 = arith.constant 0 : index
    %13 = vector.load %arg2[%c0_4, %c0_5] : memref<1x1xf32, #tpu.memory_space<vmem>>, vector<1x1xf32>
    %14 = vector.extract %13[0, 0] : f32 from vector<1x1xf32>
    %c0_6 = arith.constant 0 : index
    %c0_7 = arith.constant 0 : index
    %15 = vector.load %arg3[%c0_6, %c0_7] : memref<1x1xf32, #tpu.memory_space<vmem>>, vector<1x1xf32>
    %16 = vector.extract %15[0, 0] : f32 from vector<1x1xf32>
    %17 = vector.broadcast %14 : f32 to vector<8x128xf32>
    %18 = arith.mulf %17, %6 : vector<8x128xf32>
    %cst_8 = arith.constant 9.99999997E-7 : f32
    %19 = vector.broadcast %cst_8 : f32 to vector<8x1xf32>
    %20 = arith.addf %12, %19 : vector<8x1xf32>
    %21 = vector.broadcast %20 : vector<8x1xf32> to vector<8x128xf32>
    %22 = arith.divf %18, %21 : vector<8x128xf32>
    %23 = vector.broadcast %16 : f32 to vector<8x128xf32>
    %24 = arith.addf %22, %23 : vector<8x128xf32>
    %c0_9 = arith.constant 0 : index
    %c0_10 = arith.constant 0 : index
    %25 = vector.load %arg4[%c0_9, %c0_10] : memref<8x128xf32, #tpu.memory_space<vmem>>, vector<8x128xf32>
    tpu.vector_store %arg4[%c0_9, %c0_10], %24 {strides = array<i32>} : memref<8x128xf32, #tpu.memory_space<vmem>>, vector<8x128xf32>,
    return
  }
  func.func @transform_0(%arg0: i32) -> (i32, i32) {
    %c0_i32 = arith.constant 0 : i32
    %c0_i32_0 = arith.constant 0 : i32
    return %arg0, %c0_i32 : i32, i32
  }
  func.func @transform_1(%arg0: i32) -> (i32, i32) {
    %c0_i32 = arith.constant 0 : i32
    %c0_i32_0 = arith.constant 0 : i32
    %c0_i32_1 = arith.constant 0 : i32
    return %c0_i32, %c0_i32_0 : i32, i32
  }
  func.func @transform_2(%arg0: i32) -> (i32, i32) {
    %c0_i32 = arith.constant 0 : i32
    %c0_i32_0 = arith.constant 0 : i32
    %c0_i32_1 = arith.constant 0 : i32
    return %c0_i32, %c0_i32_0 : i32, i32
  }
  func.func @transform_3(%arg0: i32) -> (i32, i32) {
    %c0_i32 = arith.constant 0 : i32
    %c0_i32_0 = arith.constant 0 : i32
    return %arg0, %c0_i32 : i32, i32
  }
}

</mosaic_0001>

<bundles_post_ra>
// kernel: tpu_custom_call.1
= control target key start
LH: loop header
LB: loop body
LE: loop exit
PB: predicated region body
PF: predicated region fallthrough
CT: control target
= control target key end

     0   :  { %s634_s0 = inlined_call_operand.hbm [shape: f32[32,128], index: 0, kind: input, shape index: {}]   ;;  %s635_s1 = inlined_call_operand.<no memory space> [shape: f32[1,1], index: 1, kind: input, shape index: {}]   ;;  %s636_s3 = inlined_call_operand.hbm [shape: f32[32,128], index: 3, kind: output, shape index: {}]   ;;  %s637_s2 = inlined_call_operand.<no memory space> [shape: f32[1,1], index: 2, kind: input, shape index: {}]  }
   0x1   :  { %v8_v0 = vstv %s635_s1  ;;  %v10_v1 = vstv %s637_s2 }
   0x2   :  { %9 = vst [vmem:[#allocation2] sm:$0x1] %v8_v0  ;;  %11 = vst [vmem:[#allocation3] sm:$0x1] %v10_v1 }
   0x3   :  { %12 = vsyncpa [#allocation5], 0 }
   0x4   :  { %14 = vsyncpa [#allocation5 + $0x1], 0 }
   0x5   :  { %15 = vsyncpa [#allocation6], 0 }
   0x6   :  { %17 = vsyncpa [#allocation6 + $0x1], 0  ;;  %s491_s16 = smov 0   ;;  %s493_s17 = smov 0  }
   0x7   :  { %s495_s18 = smov 0   ;;  %s497_s19 = smov 0  }
   0x8 LB: > { %s512_s1 = sadd.s32 4294967295, %s461_s19   ;;  %s303_s2 = sadd.s32 4294967294, %s461_s19   ;;  %s461_s19 = sphi %s497_s19, %s653_s19   ;;  %s457_s18 = sphi %s495_s18, %s652_s18   ;;  %s453_s17 = sphi %s493_s17, %s651_s17   ;;  %s449_s16 = sphi %s491_s16, %s650_s16  }
   0x9   : > { %s516_s20 = sadd.s32 1, %s461_s19   ;;  %s30_s21 = sadd.s32 1, %s457_s18 }
   0xa   : > { %s27_s22 = ssub.s32 %s461_s19, %s516_s20  ;;  %p37_p0 = scmp.ne.s32.totalorder %s457_s18, %s453_s17 }
   0xb   : > { %p28_p1 = scmp.eq.s32.totalorder %s27_s22, 0  ;;  %p38_p2 = scmp.eq.s32.totalorder %s461_s19, 0 }
   0xc   : > { %p43_p3 = scmp.ne.s32.totalorder %s453_s17, %s449_s16  ;;  %p44_p4 = scmp.eq.s32.totalorder %s512_s1, 0 }
   0xd   : > { %s528_s23 = scalar_select %p28_p1, %s457_s18, %s30_s21  }
   0xe   : > { %p530_p5 = por %p38_p2, %p37_p0  ;;  %p534_p6 = por %p44_p4, %p43_p3 }
   0xf   : > { %p109_p7 = scmp.eq.s32.totalorder %s512_s1, 3  ;;  %p115_p8 = scmp.eq.s32.totalorder %s303_s2, 3 }
  0x10   : > { %s641_s25 = scalar_select %p534_p6, 1, 0 }
  0x11   : > { %p331_p9 = scmp.lt.s32.totalorder %s461_s19, 4  ;;  %p540_p10 = por %p109_p7, %p37_p0 }
  0x12   : > { %p544_p11 = por %p115_p8, %p43_p3  ;;  %s141_s28 = sand.u32 1, %s457_s18  }
  0x13   : > { %s642_s26 = scalar_select %p540_p10, 1, 0 }
  0x14   : > { %s643_s27 = scalar_select %p544_p11, 1, 0 }
  0x15   : > { %s307_s29 = sshll.u32 %s461_s19, 7  ;;  %s306_s30 = sshll.u32 %s141_s28, 3 }
  0x16   : > { %s553_s6 = scalar_lea.hbm %s634_s0, %s307_s29  ;;  %s145_s7 = scalar_lea.vmem [#allocation4], %s306_s30 }
  0x17   : > { %s152_s8 = sshll.u32 %s145_s7, 4  ;;  %p557_p12 = pnand %p331_p9, %p530_p5  ;;  %s561_s8 = int_to_ptr.vmem [resolvable:$true] %s152_s8 }
  0x18   : > { %s142_s10 = scalar_lea.sflag [#allocation5], %s141_s28  ;;  %s369_s11 = scalar_lea.hbm %s553_s6, 128 }
  0x19   : > { %p370_p1 = scmp.ne.s32.totalorder %s553_s6, %s369_s11  ;;  %p371_p2 = pneg %p557_p12 }
  0x1a   : > { %s374_s14 = scalar_lea.hbm %s634_s0, 512  ;;  %p375_p5 = scmp.lt.s32.totalorder %s553_s6, %s634_s0 }
  0x1b   : > { %p372_p3 = pnand %p371_p2, %p370_p1  ;;  %p376_p7 = scmp.lt.s32.totalorder %s374_s14, %s369_s11 }
  0x1d   : > { %p373_p4 = pneg %p372_p3  ;;  %p377_p8 = por %p376_p7, %p375_p5 }
  0x1f   : > { %p378_p9 = pnand %p377_p8, %p373_p4 }
  0x21   : > { %381 = shalt.err (!%p378_p9)
}
  0x22   : > { %s382_s21 = scalar_lea.vmem %s561_s8, 128  ;;  %s463_s22 = smov [#allocation4]  }
  0x23   : > { %p383_p13 = scmp.ne.s32.totalorder %s561_s8, %s382_s21  ;;  %s387_s24 = sshll.u32 %s463_s22, 4  ;;  %s388_s24 = int_to_ptr.vmem [resolvable:$false] %s387_s24 }
  0x24   : > { %s389_s28 = scalar_lea.vmem %s388_s24, 256  ;;  %p390_p3 = scmp.lt.s32.totalorder %s561_s8, %s388_s24 }
  0x25   : > { %p385_p0 = pnand %p383_p13, %p371_p2  ;;  %p391_p11 = scmp.lt.s32.totalorder %s389_s28, %s382_s21 }
  0x27   : > { %p386_p1 = pneg %p385_p0  ;;  %p392_p10 = por %p391_p11, %p390_p3 }
  0x29   : > { %p393_p6 = pnand %p392_p10, %p386_p1 }
  0x2b   : > { %396 = shalt.err (!%p393_p6)
}
  0x2c   : > { %326 = dma.hbm_to_vmem [thread:$0]  (!%p557_p12), %s553_s6, 128, %s561_s8, %s142_s10  }
  0x2d   : > { %p645_p4 = scmp.lt.s32.totalorder %s461_s19, 5  ;;  %p646_p5 = scmp.ge.s32.totalorder %s461_s19, 1 }
  0x2f   : > { %p158_p13 = pnand %p646_p5, %p645_p4 }
  0x30   : > { %s588_s29 = sand.u32 (!%p158_p13), 1, %s453_s17   ;;  %p647_p6 = scmp.ne.s32.totalorder (!%p158_p13), %s641_s25, 0 }
  0x31   : > { %161 = sbr.rel (%p158_p13) target bundleno = 391 (0x187), region = 32  ;;  %s309_s30 = sshll.u32 (!%p158_p13), %s588_s29, 3 }
  0x32   : > { %s164_s4 = scalar_lea.sflag (!%p158_p13), [#allocation5], %s588_s29  ;;  %s167_s5 = scalar_lea.vmem (!%p158_p13), [#allocation4], %s309_s30 }
  0x36   : > { %440 = dma.done.wait (%p647_p6), %s164_s4, 128  }
  0x37   : > { %442 = vsyncadd (%p647_p6), %s164_s4, 4294967168  ;;  %v190_v2 = vld [vmem:[%s167_s5] sm:$0xff]  ;;  %v207_v3 = vld [vmem:[#allocation2] sm:$0x1]  ;;  %s312_s7 = sshll.u32 %s512_s1, 7  ;;  %s189_s8 = scalar_lea.vmem [#allocation7], %s309_s30 }
  0x38   : > { %191 = vadd.xlane.f32.xlu0 %v190_v2  ;;  %315 = vpush %v207_v3  ;;  %v209_v4 = vld [vmem:[#allocation3] sm:$0x1]  ;;  %s233_s9 = sshll.u32 %s189_s8, 4  ;;  %s231_s12 = scalar_lea.hbm %s636_s3, %s312_s7  ;;  %s234_s9 = int_to_ptr.vmem [resolvable:$true] %s233_s9 }
  0x39   : > { %317 = vpush %v209_v4  ;;  %s220_s13 = scalar_lea.sflag [#allocation6], %s588_s29  ;;  %s397_s14 = scalar_lea.vmem %s234_s9, 128 }
  0x3a   : > { %p398_p10 = scmp.ne.s32.totalorder %s234_s9, %s397_s14  ;;  %p648_p11 = scmp.ne.s32.totalorder %s642_s26, 0 }
  0x3b   : > { %s464_s15 = smov [#allocation7]  }
  0x3c   : > { %p399_p12 = pnand %p398_p10, %p648_p11  ;;  %s401_s2 = sshll.u32 %s464_s15, 4  ;;  %s402_s2 = int_to_ptr.vmem [resolvable:$false] %s401_s2 }
  0x3d   : > { %s403_s1 = scalar_lea.vmem %s402_s2, 256  ;;  %p404_p2 = scmp.lt.s32.totalorder %s234_s9, %s402_s2 }
  0x3e   : > { %p400_p0 = pneg %p399_p12  ;;  %p405_p7 = scmp.lt.s32.totalorder %s403_s1, %s397_s14 }
  0x40   : > { %p406_p8 = por %p405_p7, %p404_p2 }
  0x42   : > { %p407_p9 = pnand %p406_p8, %p400_p0 }
  0x69   : > { %s316_s25 = spop %315 }
  0x6a   : > { %v211_v17 = vstv %s316_s25  ;;  %s318_s6 = spop %317 }
  0x6b   : > { %v216_v20 = vstv %s318_s6 }
  0xc1   : > { %v192_v5 = vpop.xlane.xlu0 %191 }
  0xc2   : > { %v194_v6 = vmul.f32 0.0078125, %v192_v5 }
  0xc4   : > { %v195_v7 = vsub.f32 %v190_v2, %v194_v6 }
  0xc6   : > { %v196_v8 = vmul.f32 %v195_v7, %v195_v7  ;;  %v212_v18 = vmul.f32 %v211_v17, %v195_v7 }
  0xc8   : > { %197 = vadd.xlane.f32.xlu0 %v196_v8 }
 0x151   : > { %v198_v9 = vpop.xlane.xlu0 %197 }
 0x152   : > { %v199_v10 = vmul.f32 0.007874016, %v198_v9 }
 0x154   : > { %365 = vrsqrt.f32 %v199_v10  ;;  %vm202_vm0 = vcmp.eq.f32.partialorder %v199_v10, inf  ;;  %v205_v13 = vand.u32 2147483648, %v199_v10  ;;  %vm204_vm1 = vcmp.eq.f32.partialorder %v199_v10, 0.0 }
 0x161   : > { %v366_v11 = vpop.eup %365 }
 0x162   : > { %v201_v12 = vmul.f32 %v366_v11, %v199_v10 }
 0x164   : > { %v203_v14 = vsel %vm202_vm0, %v199_v10, %v201_v12 }
 0x165   : > { %v206_v15 = vsel %vm204_vm1, %v205_v13, %v203_v14 }
 0x166   : > { %v213_v16 = vadd.f32 1e-06, %v206_v15 }
 0x168   : > { %367 = vrcp.f32 %v213_v16 }
 0x175   : > { %v368_v19 = vpop.eup %367 }
 0x176   : > { %v215_v21 = vmul.f32 %v368_v19, %v212_v18 }
 0x178   : > { %v217_v22 = vadd.f32 %v216_v20, %v215_v21 }
 0x17a   : > { %218 = vst [vmem:[%s189_s8] sm:$0xff] %v217_v22 }
 0x17b   : > { %410 = shalt.err (!%p407_p9)
}
 0x17c   : > { %s411_s21 = scalar_lea.hbm %s231_s12, 128  ;;  %s415_s28 = scalar_lea.hbm %s636_s3, 512 }
 0x17d   : > { %p412_p1 = scmp.ne.s32.totalorder %s231_s12, %s411_s21  ;;  %p416_p5 = scmp.lt.s32.totalorder %s231_s12, %s636_s3 }
 0x17e   : > { %p417_p13 = scmp.lt.s32.totalorder %s415_s28, %s411_s21 }
 0x17f   : > { %p413_p3 = pnand %p412_p1, %p648_p11 }
 0x180   : > { %p418_p6 = por %p417_p13, %p416_p5 }
 0x181   : > { %p414_p4 = pneg %p413_p3 }
 0x183   : > { %p419_p10 = pnand %p418_p6, %p414_p4 }
 0x185   : > { %422 = shalt.err (!%p419_p10)
}
 0x186   : > { %321 = dma.vmem_to_hbm [thread:$0]  (%p648_p11), %s234_s9, 128, %s231_s12, %s220_s13  }
 0x187 PF: > { %p332_p12 = scmp.ge.s32.totalorder %s461_s19, 2  ;;  %s245_s4 = sand.u32 1, %s449_s16  }
 0x188   : > { %p649_p0 = scmp.ne.s32.totalorder %s643_s27, 0  ;;  %s246_s5 = scalar_lea.sflag [#allocation6], %s245_s4 }
 0x18a   : > { %p328_p2 = pnand %p332_p12, %p649_p0 }
 0x18c   : > { %p329_p7 = pneg %p328_p2 }
 0x18e   : > { %444 = dma.done.wait (%p329_p7), %s246_s5, 128  }
 0x18f   : > { %446 = vsyncadd (%p329_p7), %s246_s5, 4294967168  ;;  %p20_p8 = scmp.ge.s32.totalorder %s516_s20, 6   ;;  %s650_s16 = smov %s453_s17 }
 0x190   : > { %s651_s17 = smov %s457_s18  ;;  %s652_s18 = smov %s528_s23 }
 0x191   : > { %s653_s19 = smov %s516_s20  ;;  %22 = sbr.rel (!%p20_p8) target bundleno = 8 (0x8), region = 77 }
 0x196   :  { %251 = vsyncpa [#allocation5], 1 }
 0x197   :  { %253 = vsyncpa [#allocation5 + $0x1], 1 }
 0x198   :  { %254 = vsyncpa [#allocation6], 1 }
 0x199   :  { %256 = vsyncpa [#allocation6 + $0x1], 1 }

</bundles_post_ra>
